<compile_context>
chip_gen: v5e
topology: v5e:2x2
jax: 0.10.0
libtpu: 0.0.40
codegen_flags: <defaults>
</compile_context>

<pallas_src>
import functools
import math

import jax
import jax.numpy as jnp
from jax.experimental import pallas as pl
from jax.experimental.pallas import tpu as pltpu
from jax.scipy.special import erf as _erf_ref

_SQRT_HALF = 0.7071067811865476

_VMEM_BUDGET = 40 << 20      # tile-planning budget (fits every TPU generation)
_VMEM_LIMIT_CAP = 56 << 20   # stay under v7x's 64 MiB physical VMEM


# ---------------------------------------------------------------------------
# In-kernel exact GELU (erf via Abramowitz & Stegun 7.1.26, |err| <= 1.5e-7)
# ---------------------------------------------------------------------------
def _erf_f32(x):
    a1, a2, a3, a4, a5 = (0.254829592, -0.284496736, 1.421413741,
                          -1.453152027, 1.061405429)
    p = 0.3275911
    ax = jnp.abs(x)
    t = 1.0 / (1.0 + p * ax)
    poly = ((((a5 * t + a4) * t + a3) * t + a2) * t + a1) * t
    e = 1.0 - poly * jnp.exp(-ax * ax)          # exp goes to the EUP slot (cheap)
    return jnp.where(x >= 0.0, e, -e)


def _gelu_exact_f32(x):
    return 0.5 * x * (1.0 + _erf_f32(x * _SQRT_HALF))


# ---------------------------------------------------------------------------
# Fused adapter kernel: one M-tile does lin1 + GELU + lin2 + bias + residual
# ---------------------------------------------------------------------------
def _adapter_kernel(x_ref, w1_ref, b1_ref, w2_ref, b2_ref, o_ref, *, mxu_dtype):
    # x_ref : (TM, Ef)     w1_ref: (Ef, MIDf)   b1_ref: (1, MIDf) f32
    # w2_ref: (MIDf, Ef)   b2_ref: (1, Ef) f32  o_ref : (TM, Ef)
    x = x_ref[...]
    x_f32 = x.astype(jnp.float32)                       # residual kept in f32

    # lin1 + GELU -- hidden activation never leaves VMEM/vregs
    h = jnp.dot(x.astype(mxu_dtype), w1_ref[...].astype(mxu_dtype),
                preferred_element_type=jnp.float32) + b1_ref[...]
    h = _gelu_exact_f32(h)

    # lin2 + bias + residual (epilogue in f32, store in output dtype)
    out = jnp.dot(h.astype(mxu_dtype), w2_ref[...].astype(mxu_dtype),
                  preferred_element_type=jnp.float32) + b2_ref[...]
    o_ref[...] = (out + x_f32).astype(o_ref.dtype)


# ---------------------------------------------------------------------------
# Tile planning: count ALL resident operands against the VMEM budget
# ---------------------------------------------------------------------------
def _plan_tiles(mf, ef, midf, x_itemsize, w_itemsize, tm_request=None):
    # Resident operands (weights single-buffered + f32 biases).
    fixed = 2 * ef * midf * w_itemsize + 4 * (midf + ef)
    # Per output row: double-buffered x/out tiles + f32 hidden + f32 residual copy.
    per_row = 4 * ef * x_itemsize + 4 * midf + 4 * ef
    if tm_request is not None:
        tm = mf if tm_request >= mf else max(8, (tm_request // 8) * 8)
    else:
        cap = max((_VMEM_BUDGET - fixed) // per_row, 8)
        tm = mf if mf <= cap else max(8, min((cap // 8) * 8, 8192))
    # 2*fixed: leave room for the double-buffered-weights fallback path.
    need = 2 * fixed + tm * per_row + (2 << 20)
    vmem_limit = int(min(max(need, 24 << 20), _VMEM_LIMIT_CAP))
    return int(tm), vmem_limit


def _make_call(kernel_fn, mf, ef, midf, tm, out_dtype, vmem_limit, single_buffer):
    const_kwargs = dict(pipeline_mode=pl.Buffered(1)) if single_buffer else {}
    return pl.pallas_call(
        kernel_fn,
        out_shape=jax.ShapeDtypeStruct((mf, ef), out_dtype),
        grid=(pl.cdiv(mf, tm),),
        in_specs=[
            pl.BlockSpec((tm, ef), lambda i: (i, 0)),                    # x tile
            pl.BlockSpec((ef, midf), lambda i: (0, 0), **const_kwargs),  # w1 (resident)
            pl.BlockSpec((1, midf), lambda i: (0, 0), **const_kwargs),   # b1
            pl.BlockSpec((midf, ef), lambda i: (0, 0), **const_kwargs),  # w2 (resident)
            pl.BlockSpec((1, ef), lambda i: (0, 0), **const_kwargs),     # b2
        ],
        out_specs=pl.BlockSpec((tm, ef), lambda i: (i, 0)),
        compiler_params=pltpu.CompilerParams(
            dimension_semantics=("parallel",),
            vmem_limit_bytes=vmem_limit),
    )


# ---------------------------------------------------------------------------
# Wrapper
# ---------------------------------------------------------------------------
def adapter_forward(x, w1, b1, w2, b2, *, tile_m=None, use_bf16_matmul=False):
    """y = lin2(gelu(lin1(x))) + x, fused in a single Pallas TPU kernel.

    x: (..., E). w1: (E, MID), w2: (MID, E)  (PyTorch Linear weights transposed),
    b1: (MID,), b2: (E,). Operands may be f32 or bf16; accumulation is always f32.
    """
    *lead, e = x.shape
    mid = w1.shape[1]
    assert w1.shape == (e, mid) and w2.shape == (mid, e), (w1.shape, w2.shape)
    assert b1.shape == (mid,) and b2.shape == (e,), (b1.shape, b2.shape)

    m = math.prod(lead) if lead else 1
    x2 = x.reshape(m, e)

    # Lane-dense fold for narrow embeddings: G = 128 // E consecutive tokens per
    # 128-lane row; weights expanded block-diagonally (pure layout plumbing, the
    # row-major HBM reshape is free).  Math is unchanged because all ops are
    # row-independent.
    fold = 1
    if e < 128 and 128 % e == 0 and m % (128 // e) == 0:
        fold = 128 // e
    if fold > 1:
        xf = x2.reshape(m // fold, fold * e)
        w1f = jnp.kron(jnp.eye(fold, dtype=w1.dtype), w1)   # (fold*E, fold*MID)
        w2f = jnp.kron(jnp.eye(fold, dtype=w2.dtype), w2)   # (fold*MID, fold*E)
        b1f, b2f = jnp.tile(b1, fold), jnp.tile(b2, fold)
    else:
        xf, w1f, w2f, b1f, b2f = x2, w1, w2, b1, b2
        # TODO(synk): if E is neither a multiple nor a divisor of 128 the stores are
        # masked (vst.msk); correct but not lane-dense.

    mf, ef = xf.shape
    midf = w1f.shape[1]

    tm_req = None if tile_m is None else max(1, tile_m // fold)
    tm, vmem_limit = _plan_tiles(mf, ef, midf, x2.dtype.itemsize,
                                 w1f.dtype.itemsize, tm_req)

    if use_bf16_matmul or (x.dtype == jnp.bfloat16 and w1.dtype == jnp.bfloat16):
        mxu_dtype = jnp.bfloat16
    else:
        mxu_dtype = jnp.float32
    kernel_fn = functools.partial(_adapter_kernel, mxu_dtype=mxu_dtype)

    b1_2d = b1f.reshape(1, midf).astype(jnp.float32)      # epilogue stays in f32
    b2_2d = b2f.reshape(1, ef).astype(jnp.float32)
    args = (xf, w1f, b1_2d, w2f, b2_2d)

    try:
        # Single-buffer the resident weights/biases (constant index maps).
        out = _make_call(kernel_fn, mf, ef, midf, tm, x.dtype, vmem_limit, True)(*args)
    except Exception:
        # Fallback: default (double-buffered) specs if Buffered(1) is rejected.
        out = _make_call(kernel_fn, mf, ef, midf, tm, x.dtype, vmem_limit, False)(*args)

    return out.reshape(m, e).reshape(*lead, e)


# ---------------------------------------------------------------------------
# Demo / self-check
# ---------------------------------------------------------------------------
if __name__ == "__main__":
    def reference(x, w1, b1, w2, b2):
        h = x @ w1 + b1
        h = 0.5 * h * (1.0 + _erf_ref(h * _SQRT_HALF))   # exact GELU (nn.GELU default)
        return h @ w2 + b2 + x

    key = jax.random.PRNGKey(0)
    kx, k1, k2, k3, k4, kx2 = jax.random.split(key, 6)

    # Adapter(embedding_dim=32, mlp_dim=64) on tokens of shape (batch=2, seq=8, 32)
    B, S, E, MID = 2, 8, 32, 64
    x = jax.random.normal(kx, (B, S, E), jnp.float32)
    w1 = jax.random.normal(k1, (E, MID), jnp.float32) * 0.1
    b1 = jax.random.normal(k2, (MID,), jnp.float32) * 0.1
    w2 = jax.random.normal(k3, (MID, E), jnp.float32) * 0.1
    b2 = jax.random.normal(k4, (E,), jnp.float32) * 0.1
    y_ref = reference(x, w1, b1, w2, b2)

    # f32 path (lane-dense fold: 4 tokens per 128-lane row, K=128 / N=256 matmuls).
    y = adapter_forward(x, w1, b1, w2, b2)
    jax.block_until_ready(y)
    assert y.shape == x.shape, y.shape
    assert jnp.all(jnp.isfinite(y))
    assert jnp.allclose(y, y_ref, atol=1e-4, rtol=1e-4), \
        float(jnp.max(jnp.abs(y - y_ref)))

    # bf16 operand path (half the HBM bytes, bf16 MXU; f32 accumulation/epilogue).
    y_bf = adapter_forward(x.astype(jnp.bfloat16), w1.astype(jnp.bfloat16), b1,
                           w2.astype(jnp.bfloat16), b2)
    jax.block_until_ready(y_bf)
    assert jnp.allclose(y_bf.astype(jnp.float32), y_ref, atol=0.1, rtol=0.05)

    # Wide-embedding path (no fold), multi-step grid, in-kernel bf16-matmul flag.
    E2, MID2 = 128, 256
    kxa, kw1, kb1, kw2, kb2 = jax.random.split(kx2, 5)
    x_2 = jax.random.normal(kxa, (4, 8, E2), jnp.float32)
    w1_2 = jax.random.normal(kw1, (E2, MID2), jnp.float32) * 0.05
    b1_2 = jax.random.normal(kb1, (MID2,), jnp.float32) * 0.05
    w2_2 = jax.random.normal(kw2, (MID2, E2), jnp.float32) * 0.05
    b2_2 = jax.random.normal(kb2, (E2,), jnp.float32) * 0.05
    y2_ref = reference(x_2, w1_2, b1_2, w2_2, b2_2)
    y2 = adapter_forward(x_2, w1_2, b1_2, w2_2, b2_2, tile_m=16, use_bf16_matmul=True)
    jax.block_until_ready(y2)
    assert y2.shape == x_2.shape, y2.shape
    assert jnp.allclose(y2, y2_ref, atol=0.1, rtol=0.05)

    print("KERNEL_OK")
</pallas_src>

<mosaic_0001>
module attributes {stable_mosaic.version = 11 : i64} {
  func.func @_adapter_kernel(%arg0: i32, %arg1: memref<4x128xf32, #tpu.memory_space<vmem>>, %arg2: memref<128x256xf32, #tpu.memory_space<vmem>>, %arg3: memref<1x256xf32, #tpu.memory_space<vmem>>, %arg4: memref<256x128xf32, #tpu.memory_space<vmem>>, %arg5: memref<1x128xf32, #tpu.memory_space<vmem>>, %arg6: memref<4x128xf32, #tpu.memory_space<vmem>>) attributes {dimension_semantics = [#tpu.dimension_semantics<parallel>], iteration_bounds = array<i64: 1>, scalar_prefetch = 0 : i64, scratch_operands = 0 : i64, tpu.core_type = #tpu.core_type<tc>, window_params = [{transform_indices = @transform_0, window_bounds = array<i64: 4, 128>}, {pipeline_mode = #tpu.pipeline_mode<synchronous>, transform_indices = @transform_1, window_bounds = array<i64: 128, 256>}, {pipeline_mode = #tpu.pipeline_mode<synchronous>, transform_indices = @transform_2, window_bounds = array<i64: 1, 256>}, {pipeline_mode = #tpu.pipeline_mode<synchronous>, transform_indices = @transform_3, window_bounds = array<i64: 256, 128>}, {pipeline_mode = #tpu.pipeline_mode<synchronous>, transform_indices = @transform_4, window_bounds = array<i64: 1, 128>}, {transform_indices = @transform_5, window_bounds = array<i64: 4, 128>}]} {
    %c0 = arith.constant 0 : index
    %c0_0 = arith.constant 0 : index
    %0 = vector.load %arg1[%c0, %c0_0] : memref<4x128xf32, #tpu.memory_space<vmem>>, vector<4x128xf32>
    %c0_1 = arith.constant 0 : index
    %c0_2 = arith.constant 0 : index
    %1 = vector.load %arg2[%c0_1, %c0_2] : memref<128x256xf32, #tpu.memory_space<vmem>>, vector<128x256xf32>
    %cst = arith.constant dense<0.000000e+00> : vector<4x256xf32>
    %2 = tpu.matmul %0, %1, %cst {dimension_numbers = #tpu.dot_dimension_numbers<[1], [0], [0], [1], [0, 0, 1, 1], [], []>} : vector<4x128xf32>, vector<128x256xf32>, vector<4x256xf32> -> vector<4x256xf32>
    %c0_3 = arith.constant 0 : index
    %c0_4 = arith.constant 0 : index
    %3 = vector.load %arg3[%c0_3, %c0_4] : memref<1x256xf32, #tpu.memory_space<vmem>>, vector<1x256xf32>
    %4 = vector.broadcast %3 : vector<1x256xf32> to vector<4x256xf32>
    %5 = arith.addf %2, %4 : vector<4x256xf32>
    %cst_5 = arith.constant 5.000000e-01 : f32
    %6 = vector.broadcast %cst_5 : f32 to vector<4x256xf32>
    %7 = arith.mulf %6, %5 : vector<4x256xf32>
    %cst_6 = arith.constant 0.707106769 : f32
    %8 = vector.broadcast %cst_6 : f32 to vector<4x256xf32>
    %9 = arith.mulf %5, %8 : vector<4x256xf32>
    %10 = math.absf %9 : vector<4x256xf32>
    %cst_7 = arith.constant 0.327591091 : f32
    %11 = vector.broadcast %cst_7 : f32 to vector<4x256xf32>
    %12 = arith.mulf %11, %10 : vector<4x256xf32>
    %cst_8 = arith.constant 1.000000e+00 : f32
    %13 = vector.broadcast %cst_8 : f32 to vector<4x256xf32>
    %14 = arith.addf %13, %12 : vector<4x256xf32>
    %cst_9 = arith.constant 1.000000e+00 : f32
    %15 = vector.broadcast %cst_9 : f32 to vector<4x256xf32>
    %16 = arith.divf %15, %14 : vector<4x256xf32>
    %cst_10 = arith.constant 1.06140542 : f32
    %17 = vector.broadcast %cst_10 : f32 to vector<4x256xf32>
    %18 = arith.mulf %17, %16 : vector<4x256xf32>
    %cst_11 = arith.constant -1.45315206 : f32
    %19 = vector.broadcast %cst_11 : f32 to vector<4x256xf32>
    %20 = arith.addf %18, %19 : vector<4x256xf32>
    %21 = arith.mulf %20, %16 : vector<4x256xf32>
    %cst_12 = arith.constant 1.42141378 : f32
    %22 = vector.broadcast %cst_12 : f32 to vector<4x256xf32>
    %23 = arith.addf %21, %22 : vector<4x256xf32>
    %24 = arith.mulf %23, %16 : vector<4x256xf32>
    %cst_13 = arith.constant -0.284496725 : f32
    %25 = vector.broadcast %cst_13 : f32 to vector<4x256xf32>
    %26 = arith.addf %24, %25 : vector<4x256xf32>
    %27 = arith.mulf %26, %16 : vector<4x256xf32>
    %cst_14 = arith.constant 0.254829586 : f32
    %28 = vector.broadcast %cst_14 : f32 to vector<4x256xf32>
    %29 = arith.addf %27, %28 : vector<4x256xf32>
    %30 = arith.mulf %29, %16 : vector<4x256xf32>
    %cst_15 = arith.constant 0.000000e+00 : f32
    %31 = vector.broadcast %cst_15 : f32 to vector<4x256xf32>
    %32 = arith.subf %31, %10 : vector<4x256xf32>
    %33 = arith.mulf %32, %10 : vector<4x256xf32>
    %34 = math.exp %33 : vector<4x256xf32>
    %35 = arith.mulf %30, %34 : vector<4x256xf32>
    %cst_16 = arith.constant 1.000000e+00 : f32
    %36 = vector.broadcast %cst_16 : f32 to vector<4x256xf32>
    %37 = arith.subf %36, %35 : vector<4x256xf32>
    %cst_17 = arith.constant 0.000000e+00 : f32
    %38 = vector.broadcast %cst_17 : f32 to vector<4x256xf32>
    %39 = arith.cmpf oge, %9, %38 : vector<4x256xf32>
    %cst_18 = arith.constant 0.000000e+00 : f32
    %40 = vector.broadcast %cst_18 : f32 to vector<4x256xf32>
    %41 = arith.subf %40, %37 : vector<4x256xf32>
    %42 = arith.select %39, %37, %41 : vector<4x256xi1>, vector<4x256xf32>
    %cst_19 = arith.constant 1.000000e+00 : f32
    %43 = vector.broadcast %cst_19 : f32 to vector<4x256xf32>
    %44 = arith.addf %43, %42 : vector<4x256xf32>
    %45 = arith.mulf %7, %44 : vector<4x256xf32>
    %c0_20 = arith.constant 0 : index
    %c0_21 = arith.constant 0 : index
    %46 = vector.load %arg4[%c0_20, %c0_21] : memref<256x128xf32, #tpu.memory_space<vmem>>, vector<256x128xf32>
    %cst_22 = arith.constant dense<0.000000e+00> : vector<4x128xf32>
    %47 = tpu.matmul %45, %46, %cst_22 {dimension_numbers = #tpu.dot_dimension_numbers<[1], [0], [0], [1], [0, 0, 1, 1], [], []>} : vector<4x256xf32>, vector<256x128xf32>, vector<4x128xf32> -> vector<4x128xf32>
    %c0_23 = arith.constant 0 : index
    %c0_24 = arith.constant 0 : index
    %48 = vector.load %arg5[%c0_23, %c0_24] : memref<1x128xf32, #tpu.memory_space<vmem>>, vector<1x128xf32>
    %49 = vector.broadcast %48 : vector<1x128xf32> to vector<4x128xf32>
    %50 = arith.addf %47, %49 : vector<4x128xf32>
    %51 = arith.addf %50, %0 : vector<4x128xf32>
    %c0_25 = arith.constant 0 : index
    %c0_26 = arith.constant 0 : index
    %52 = vector.load %arg6[%c0_25, %c0_26] : memref<4x128xf32, #tpu.memory_space<vmem>>, vector<4x128xf32>
    tpu.vector_store %arg6[%c0_25, %c0_26], %51 {strides = array<i32>} : memref<4x128xf32, #tpu.memory_space<vmem>>, vector<4x128xf32>,
    return
  }
  func.func @transform_0(%arg0: i32) -> (i32, i32) {
    %c0_i32 = arith.constant 0 : i32
    %c0_i32_0 = arith.constant 0 : i32
    return %arg0, %c0_i32 : i32, i32
  }
  func.func @transform_1(%arg0: i32) -> (i32, i32) {
    %c0_i32 = arith.constant 0 : i32
    %c0_i32_0 = arith.constant 0 : i32
    %c0_i32_1 = arith.constant 0 : i32
    return %c0_i32, %c0_i32_0 : i32, i32
  }
  func.func @transform_2(%arg0: i32) -> (i32, i32) {
    %c0_i32 = arith.constant 0 : i32
    %c0_i32_0 = arith.constant 0 : i32
    %c0_i32_1 = arith.constant 0 : i32
    return %c0_i32, %c0_i32_0 : i32, i32
  }
  func.func @transform_3(%arg0: i32) -> (i32, i32) {
    %c0_i32 = arith.constant 0 : i32
    %c0_i32_0 = arith.constant 0 : i32
    %c0_i32_1 = arith.constant 0 : i32
    return %c0_i32, %c0_i32_0 : i32, i32
  }
  func.func @transform_4(%arg0: i32) -> (i32, i32) {
    %c0_i32 = arith.constant 0 : i32
    %c0_i32_0 = arith.constant 0 : i32
    %c0_i32_1 = arith.constant 0 : i32
    return %c0_i32, %c0_i32_0 : i32, i32
  }
  func.func @transform_5(%arg0: i32) -> (i32, i32) {
    %c0_i32 = arith.constant 0 : i32
    %c0_i32_0 = arith.constant 0 : i32
    return %arg0, %c0_i32 : i32, i32
  }
}

module attributes {stable_mosaic.version = 11 : i64} {
  func.func @_adapter_kernel(%arg0: i32, %arg1: memref<4x128xf32, #tpu.memory_space<vmem>>, %arg2: memref<128x256xf32, #tpu.memory_space<vmem>>, %arg3: memref<1x256xf32, #tpu.memory_space<vmem>>, %arg4: memref<256x128xf32, #tpu.memory_space<vmem>>, %arg5: memref<1x128xf32, #tpu.memory_space<vmem>>, %arg6: memref<4x128xf32, #tpu.memory_space<vmem>>) attributes {dimension_semantics = [#tpu.dimension_semantics<parallel>], iteration_bounds = array<i64: 1>, scalar_prefetch = 0 : i64, scratch_operands = 0 : i64, tpu.core_type = #tpu.core_type<tc>, window_params = [{transform_indices = @transform_0, window_bounds = array<i64: 4, 128>}, {pipeline_mode = #tpu.pipeline_mode<synchronous>, transform_indices = @transform_1, window_bounds = array<i64: 128, 256>}, {pipeline_mode = #tpu.pipeline_mode<synchronous>, transform_indices = @transform_2, window_bounds = array<i64: 1, 256>}, {pipeline_mode = #tpu.pipeline_mode<synchronous>, transform_indices = @transform_3, window_bounds = array<i64: 256, 128>}, {pipeline_mode = #tpu.pipeline_mode<synchronous>, transform_indices = @transform_4, window_bounds = array<i64: 1, 128>}, {transform_indices = @transform_5, window_bounds = array<i64: 4, 128>}]} {
    %c0 = arith.constant 0 : index
    %c0_0 = arith.constant 0 : index
    %0 = vector.load %arg1[%c0, %c0_0] : memref<4x128xf32, #tpu.memory_space<vmem>>, vector<4x128xf32>
    %c0_1 = arith.constant 0 : index
    %c0_2 = arith.constant 0 : index
    %1 = vector.load %arg2[%c0_1, %c0_2] : memref<128x256xf32, #tpu.memory_space<vmem>>, vector<128x256xf32>
    %cst = arith.constant dense<0.000000e+00> : vector<4x256xf32>
    %2 = tpu.matmul %0, %1, %cst {dimension_numbers = #tpu.dot_dimension_numbers<[1], [0], [0], [1], [0, 0, 1, 1], [], []>} : vector<4x128xf32>, vector<128x256xf32>, vector<4x256xf32> -> vector<4x256xf32>
    %c0_3 = arith.constant 0 : index
    %c0_4 = arith.constant 0 : index
    %3 = vector.load %arg3[%c0_3, %c0_4] : memref<1x256xf32, #tpu.memory_space<vmem>>, vector<1x256xf32>
    %4 = vector.broadcast %3 : vector<1x256xf32> to vector<4x256xf32>
    %5 = arith.addf %2, %4 : vector<4x256xf32>
    %cst_5 = arith.constant 5.000000e-01 : f32
    %6 = vector.broadcast %cst_5 : f32 to vector<4x256xf32>
    %7 = arith.mulf %6, %5 : vector<4x256xf32>
    %cst_6 = arith.constant 0.707106769 : f32
    %8 = vector.broadcast %cst_6 : f32 to vector<4x256xf32>
    %9 = arith.mulf %5, %8 : vector<4x256xf32>
    %10 = math.absf %9 : vector<4x256xf32>
    %cst_7 = arith.constant 0.327591091 : f32
    %11 = vector.broadcast %cst_7 : f32 to vector<4x256xf32>
    %12 = arith.mulf %11, %10 : vector<4x256xf32>
    %cst_8 = arith.constant 1.000000e+00 : f32
    %13 = vector.broadcast %cst_8 : f32 to vector<4x256xf32>
    %14 = arith.addf %13, %12 : vector<4x256xf32>
    %cst_9 = arith.constant 1.000000e+00 : f32
    %15 = vector.broadcast %cst_9 : f32 to vector<4x256xf32>
    %16 = arith.divf %15, %14 : vector<4x256xf32>
    %cst_10 = arith.constant 1.06140542 : f32
    %17 = vector.broadcast %cst_10 : f32 to vector<4x256xf32>
    %18 = arith.mulf %17, %16 : vector<4x256xf32>
    %cst_11 = arith.constant -1.45315206 : f32
    %19 = vector.broadcast %cst_11 : f32 to vector<4x256xf32>
    %20 = arith.addf %18, %19 : vector<4x256xf32>
    %21 = arith.mulf %20, %16 : vector<4x256xf32>
    %cst_12 = arith.constant 1.42141378 : f32
    %22 = vector.broadcast %cst_12 : f32 to vector<4x256xf32>
    %23 = arith.addf %21, %22 : vector<4x256xf32>
    %24 = arith.mulf %23, %16 : vector<4x256xf32>
    %cst_13 = arith.constant -0.284496725 : f32
    %25 = vector.broadcast %cst_13 : f32 to vector<4x256xf32>
    %26 = arith.addf %24, %25 : vector<4x256xf32>
    %27 = arith.mulf %26, %16 : vector<4x256xf32>
    %cst_14 = arith.constant 0.254829586 : f32
    %28 = vector.broadcast %cst_14 : f32 to vector<4x256xf32>
    %29 = arith.addf %27, %28 : vector<4x256xf32>
    %30 = arith.mulf %29, %16 : vector<4x256xf32>
    %cst_15 = arith.constant 0.000000e+00 : f32
    %31 = vector.broadcast %cst_15 : f32 to vector<4x256xf32>
    %32 = arith.subf %31, %10 : vector<4x256xf32>
    %33 = arith.mulf %32, %10 : vector<4x256xf32>
    %34 = math.exp %33 : vector<4x256xf32>
    %35 = arith.mulf %30, %34 : vector<4x256xf32>
    %cst_16 = arith.constant 1.000000e+00 : f32
    %36 = vector.broadcast %cst_16 : f32 to vector<4x256xf32>
    %37 = arith.subf %36, %35 : vector<4x256xf32>
    %cst_17 = arith.constant 0.000000e+00 : f32
    %38 = vector.broadcast %cst_17 : f32 to vector<4x256xf32>
    %39 = arith.cmpf oge, %9, %38 : vector<4x256xf32>
    %cst_18 = arith.constant 0.000000e+00 : f32
    %40 = vector.broadcast %cst_18 : f32 to vector<4x256xf32>
    %41 = arith.subf %40, %37 : vector<4x256xf32>
    %42 = arith.select %39, %37, %41 : vector<4x256xi1>, vector<4x256xf32>
    %cst_19 = arith.constant 1.000000e+00 : f32
    %43 = vector.broadcast %cst_19 : f32 to vector<4x256xf32>
    %44 = arith.addf %43, %42 : vector<4x256xf32>
    %45 = arith.mulf %7, %44 : vector<4x256xf32>
    %c0_20 = arith.constant 0 : index
    %c0_21 = arith.constant 0 : index
    %46 = vector.load %arg4[%c0_20, %c0_21] : memref<256x128xf32, #tpu.memory_space<vmem>>, vector<256x128xf32>
    %cst_22 = arith.constant dense<0.000000e+00> : vector<4x128xf32>
    %47 = tpu.matmul %45, %46, %cst_22 {dimension_numbers = #tpu.dot_dimension_numbers<[1], [0], [0], [1], [0, 0, 1, 1], [], []>} : vector<4x256xf32>, vector<256x128xf32>, vector<4x128xf32> -> vector<4x128xf32>
    %c0_23 = arith.constant 0 : index
    %c0_24 = arith.constant 0 : index
    %48 = vector.load %arg5[%c0_23, %c0_24] : memref<1x128xf32, #tpu.memory_space<vmem>>, vector<1x128xf32>
    %49 = vector.broadcast %48 : vector<1x128xf32> to vector<4x128xf32>
    %50 = arith.addf %47, %49 : vector<4x128xf32>
    %51 = arith.addf %50, %0 : vector<4x128xf32>
    %c0_25 = arith.constant 0 : index
    %c0_26 = arith.constant 0 : index
    %52 = vector.load %arg6[%c0_25, %c0_26] : memref<4x128xf32, #tpu.memory_space<vmem>>, vector<4x128xf32>
    tpu.vector_store %arg6[%c0_25, %c0_26], %51 {strides = array<i32>} : memref<4x128xf32, #tpu.memory_space<vmem>>, vector<4x128xf32>,
    return
  }
  func.func @transform_0(%arg0: i32) -> (i32, i32) {
    %c0_i32 = arith.constant 0 : i32
    %c0_i32_0 = arith.constant 0 : i32
    return %arg0, %c0_i32 : i32, i32
  }
  func.func @transform_1(%arg0: i32) -> (i32, i32) {
    %c0_i32 = arith.constant 0 : i32
    %c0_i32_0 = arith.constant 0 : i32
    %c0_i32_1 = arith.constant 0 : i32
    return %c0_i32, %c0_i32_0 : i32, i32
  }
  func.func @transform_2(%arg0: i32) -> (i32, i32) {
    %c0_i32 = arith.constant 0 : i32
    %c0_i32_0 = arith.constant 0 : i32
    %c0_i32_1 = arith.constant 0 : i32
    return %c0_i32, %c0_i32_0 : i32, i32
  }
  func.func @transform_3(%arg0: i32) -> (i32, i32) {
    %c0_i32 = arith.constant 0 : i32
    %c0_i32_0 = arith.constant 0 : i32
    %c0_i32_1 = arith.constant 0 : i32
    return %c0_i32, %c0_i32_0 : i32, i32
  }
  func.func @transform_4(%arg0: i32) -> (i32, i32) {
    %c0_i32 = arith.constant 0 : i32
    %c0_i32_0 = arith.constant 0 : i32
    %c0_i32_1 = arith.constant 0 : i32
    return %c0_i32, %c0_i32_0 : i32, i32
  }
  func.func @transform_5(%arg0: i32) -> (i32, i32) {
    %c0_i32 = arith.constant 0 : i32
    %c0_i32_0 = arith.constant 0 : i32
    return %arg0, %c0_i32 : i32, i32
  }
}

</mosaic_0001>

<bundles_post_ra>
// kernel: tpu_custom_call.1
= control target key start
LH: loop header
LB: loop body
LE: loop exit
PB: predicated region body
PF: predicated region fallthrough
CT: control target
= control target key end

     0   :  { %10 = vsyncpa [#allocation3], 0  ;;  %s570_s0 = inlined_call_operand.hbm [shape: f32[4,128], index: 0, kind: input, shape index: {}]   ;;  %s571_s1 = inlined_call_operand.hbm [shape: f32[128,256], index: 1, kind: input, shape index: {}]   ;;  %s572_s2 = inlined_call_operand.hbm [shape: f32[1,256], index: 2, kind: input, shape index: {}]   ;;  %s573_s3 = inlined_call_operand.hbm [shape: f32[256,128], index: 3, kind: input, shape index: {}]   ;;  %s574_s4 = inlined_call_operand.vmem [shape: f32[1,128], index: 4, kind: input, shape index: {}]   ;;  %s575_s5 = inlined_call_operand.hbm [shape: f32[4,128], index: 5, kind: output, shape index: {}]  }
   0x1   :  { %11 = vsyncpa [#allocation6], 0 }
   0x2   :  { %12 = vsyncpa [#allocation9], 0  ;;  %s29_s20 = sshll.u32 %s571_s1, 4  ;;  %s30_s20 = int_to_ptr.hbm [resolvable:$true] %s29_s20 }
   0x3   :  { %13 = vsyncpa [#allocation4], 0  ;;  %s482_s21 = smov [#allocation5]   ;;  %s19_s25 = sshll.u32 %s570_s0, 4  ;;  %s20_s25 = int_to_ptr.hbm [resolvable:$true] %s19_s25 }
   0x4   :  { %s31_s22 = sshll.u32 %s482_s21, 4  ;;  %s483_s26 = smov 256   ;;  %s32_s22 = int_to_ptr.vmem [resolvable:$true] %s31_s22 }
   0x5   :  { %s484_s27 = smov 16   ;;  %s485_s28 = smov [#allocation2]  }
   0x6   :  { %37 = dma.hbm_to_vmem [thread:$0]  %s30_s20, 4096, %s32_s22, [#allocation6], %s483_s26, %s483_s26, %s484_s27  }
   0x7   :  { %s21_s29 = sshll.u32 %s485_s28, 4  ;;  %s43_s7 = sshll.u32 %s572_s2, 4  ;;  %s22_s29 = int_to_ptr.vmem [resolvable:$true] %s21_s29  ;;  %s44_s7 = int_to_ptr.hbm [resolvable:$true] %s43_s7 }
   0x8   :  { %24 = dma.hbm_to_vmem [thread:$0]  %s20_s25, 64, %s22_s29, [#allocation3]  }
   0x9   :  { %s53_s9 = sshll.u32 %s573_s3, 4  ;;  %s486_s10 = smov [#allocation7]   ;;  %s54_s9 = int_to_ptr.hbm [resolvable:$true] %s53_s9 }
   0xa   :  { %s45_s11 = sshll.u32 %s486_s10, 4  ;;  %s487_s0 = smov [#allocation8]   ;;  %s46_s11 = int_to_ptr.vmem [resolvable:$true] %s45_s11 }
   0xb   :  { %48 = dma.hbm_to_vmem [thread:$0]  %s44_s7, 32, %s46_s11, [#allocation6]  }
   0xc   :  { %s55_s12 = sshll.u32 %s487_s0, 4  ;;  %s488_s13 = smov 128   ;;  %s56_s12 = int_to_ptr.vmem [resolvable:$true] %s55_s12 }
   0xd   :  { %s489_s14 = smov 8  }
   0xe   :  { %61 = dma.hbm_to_vmem [thread:$0]  %s54_s9, 4096, %s56_s12, [#allocation9], %s488_s13, %s488_s13, %s489_s14  }
   0xf   :  { %474 = dma.done.wait [#allocation3], 64  }
  0x10   :  { %475 = vsyncadd [#allocation3], 4294967232 }
  0x11   :  { %476 = dma.done.wait [#allocation6], 4128  }
  0x12   :  { %477 = vsyncadd [#allocation6], 4294963168 }
  0x13   :  { %478 = dma.done.wait [#allocation9], 4096  }
  0x14   :  { %479 = vsyncadd [#allocation9], 4294963200  ;;  %v111_v0 = vld [vmem:[#allocation5 + $0xf0] sm:$0xff]  ;;  %v112_v1 = vld [vmem:[#allocation5 + $0xf8] sm:$0xff]  ;;  %s490_s15 = smov [#allocation10]   ;;  %s324_s19 = sshll.u32 %s575_s5, 4  ;;  %s325_s19 = int_to_ptr.hbm [resolvable:$true] %s324_s19 }
  0x15   :  { %v109_v2 = vld [vmem:[#allocation5 + $0xe0] sm:$0xff]  ;;  %119 = vmatpush.msra.mxu0 %v111_v0  ;;  %139 = vmatpush.msra.mxu1 %v112_v1  ;;  %v110_v3 = vld [vmem:[#allocation5 + $0xe8] sm:$0xff]  ;;  %v107_v4 = vld [vmem:[#allocation5 + $0xd0] sm:$0xff]  ;;  %s322_s16 = sshll.u32 %s490_s15, 4  ;;  %s323_s16 = int_to_ptr.vmem [resolvable:$true] %s322_s16 }
  0x16   :  { %v108_v5 = vld [vmem:[#allocation5 + $0xd8] sm:$0xff]  ;;  %v105_v6 = vld [vmem:[#allocation5 + $0xc0] sm:$0xff]  ;;  %v106_v7 = vld [vmem:[#allocation5 + $0xc8] sm:$0xff] }
  0x17   :  { %120 = vmatpush.msra.mxu0 %v109_v2  ;;  %140 = vmatpush.msra.mxu1 %v110_v3  ;;  %v103_v8 = vld [vmem:[#allocation5 + $0xb0] sm:$0xff]  ;;  %v104_v9 = vld [vmem:[#allocation5 + $0xb8] sm:$0xff]  ;;  %v101_v10 = vld [vmem:[#allocation5 + $0xa0] sm:$0xff] }
  0x18   :  { %v102_v11 = vld [vmem:[#allocation5 + $0xa8] sm:$0xff]  ;;  %v99_v12 = vld [vmem:[#allocation5 + $0x90] sm:$0xff]  ;;  %v100_v13 = vld [vmem:[#allocation5 + $0x98] sm:$0xff] }
  0x19   :  { %121 = vmatpush.msra.mxu0 %v107_v4  ;;  %141 = vmatpush.msra.mxu1 %v108_v5  ;;  %v97_v14 = vld [vmem:[#allocation5 + $0x80] sm:$0xff]  ;;  %v98_v15 = vld [vmem:[#allocation5 + $0x88] sm:$0xff]  ;;  %v95_v16 = vld [vmem:[#allocation5 + $0x70] sm:$0xff] }
  0x1a   :  { %v96_v17 = vld [vmem:[#allocation5 + $0x78] sm:$0xff]  ;;  %v93_v18 = vld [vmem:[#allocation5 + $0x60] sm:$0xff]  ;;  %v94_v19 = vld [vmem:[#allocation5 + $0x68] sm:$0xff] }
  0x1b   :  { %122 = vmatpush.msra.mxu0 %v105_v6  ;;  %142 = vmatpush.msra.mxu1 %v106_v7  ;;  %v91_v20 = vld [vmem:[#allocation5 + $0x50] sm:$0xff]  ;;  %v92_v21 = vld [vmem:[#allocation5 + $0x58] sm:$0xff]  ;;  %v89_v22 = vld [vmem:[#allocation5 + $0x40] sm:$0xff] }
  0x1c   :  { %v90_v23 = vld [vmem:[#allocation5 + $0x48] sm:$0xff]  ;;  %v87_v24 = vld [vmem:[#allocation5 + $0x30] sm:$0xff]  ;;  %v88_v25 = vld [vmem:[#allocation5 + $0x38] sm:$0xff] }
  0x1d   :  { %123 = vmatpush.msra.mxu0 %v103_v8  ;;  %143 = vmatpush.msra.mxu1 %v104_v9  ;;  %v85_v26 = vld [vmem:[#allocation5 + $0x20] sm:$0xff]  ;;  %v86_v27 = vld [vmem:[#allocation5 + $0x28] sm:$0xff]  ;;  %v83_v28 = vld [vmem:[#allocation5 + $0x10] sm:$0xff] }
  0x1e   :  { %v84_v29 = vld [vmem:[#allocation5 + $0x18] sm:$0xff]  ;;  %v81_v30 = vld [vmem:[#allocation5] sm:$0xff]  ;;  %v82_v31 = vld [vmem:[#allocation5 + $0x8] sm:$0xff] }
  0x1f   :  { %124 = vmatpush.msra.mxu0 %v101_v10  ;;  %144 = vmatpush.msra.mxu1 %v102_v11  ;;  %v533_v32 = vld [vmem:[#allocation2] sm:$0xf]  ;;  %v253_v35 = vld [vmem:[#allocation8 + $0x70] sm:$0xff]  ;;  %v252_v37 = vld [vmem:[#allocation8 + $0x68] sm:$0xff] }
  0x20   :  { %v254_v33 = vld [vmem:[#allocation8 + $0x78] sm:$0xff]  ;;  %v269_v36 = vld [vmem:[#allocation8 + $0xf0] sm:$0xff]  ;;  %v268_v38 = vld [vmem:[#allocation8 + $0xe8] sm:$0xff] }
  0x21   :  { %125 = vmatpush.msra.mxu0 %v99_v12  ;;  %145 = vmatpush.msra.mxu1 %v100_v13  ;;  %v270_v34 = vld [vmem:[#allocation8 + $0xf8] sm:$0xff]  ;;  %v251_v40 = vld [vmem:[#allocation8 + $0x60] sm:$0xff]  ;;  %v249_v46 = vld [vmem:[#allocation8 + $0x50] sm:$0xff] }
  0x22   :  { %275 = vmatpush.msra.mxu2 %v254_v33  ;;  %295 = vmatpush.msra.mxu3 %v270_v34  ;;  %v113_v39 = vld [vmem:[#allocation7] sm:$0x3]  ;;  %v267_v41 = vld [vmem:[#allocation8 + $0xe0] sm:$0xff]  ;;  %v265_v47 = vld [vmem:[#allocation8 + $0xd0] sm:$0xff] }
  0x23   :  { %126 = vmatpush.msra.mxu0 %v97_v14  ;;  %146 = vmatpush.msra.mxu1 %v98_v15  ;;  %v115_v42 = vperm.slane %v113_v39, 0  ;;  %v116_v43 = vperm.slane %v113_v39, 1  ;;  %v250_v44 = vld [vmem:[#allocation8 + $0x58] sm:$0xff]  ;;  %v248_v52 = vld [vmem:[#allocation8 + $0x48] sm:$0xff]  ;;  %v247_v56 = vld [vmem:[#allocation8 + $0x40] sm:$0xff] }
  0x24   :  { %276 = vmatpush.msra.mxu2 %v253_v35  ;;  %296 = vmatpush.msra.mxu3 %v269_v36  ;;  %v266_v45 = vld [vmem:[#allocation8 + $0xd8] sm:$0xff]  ;;  %v264_v53 = vld [vmem:[#allocation8 + $0xc8] sm:$0xff]  ;;  %v263_v57 = vld [vmem:[#allocation8 + $0xc0] sm:$0xff] }
  0x25   :  { %127 = vmatpush.msra.mxu0 %v95_v16  ;;  %147 = vmatpush.msra.mxu1 %v96_v17  ;;  %v246_v60 = vld [vmem:[#allocation8 + $0x38] sm:$0xff]  ;;  %v245_v0 = vld [vmem:[#allocation8 + $0x30] sm:$0xff]  ;;  %v244_v4 = vld [vmem:[#allocation8 + $0x28] sm:$0xff] }
  0x26   :  { %277 = vmatpush.msra.mxu2 %v252_v37  ;;  %297 = vmatpush.msra.mxu3 %v268_v38  ;;  %v262_v61 = vld [vmem:[#allocation8 + $0xb8] sm:$0xff]  ;;  %v261_v1 = vld [vmem:[#allocation8 + $0xb0] sm:$0xff]  ;;  %v260_v5 = vld [vmem:[#allocation8 + $0xa8] sm:$0xff] }
  0x27   :  { %128 = vmatpush.msra.mxu0 %v93_v18  ;;  %148 = vmatpush.msra.mxu1 %v94_v19  ;;  %v243_v6 = vld [vmem:[#allocation8 + $0x20] sm:$0xff]  ;;  %v242_v8 = vld [vmem:[#allocation8 + $0x18] sm:$0xff]  ;;  %v241_v10 = vld [vmem:[#allocation8 + $0x10] sm:$0xff] }
  0x28   :  { %278 = vmatpush.msra.mxu2 %v251_v40  ;;  %298 = vmatpush.msra.mxu3 %v267_v41  ;;  %v259_v7 = vld [vmem:[#allocation8 + $0xa0] sm:$0xff]  ;;  %v258_v9 = vld [vmem:[#allocation8 + $0x98] sm:$0xff]  ;;  %v257_v11 = vld [vmem:[#allocation8 + $0x90] sm:$0xff] }
  0x29   :  { %129 = vmatpush.msra.mxu0 %v91_v20  ;;  %149 = vmatpush.msra.mxu1 %v92_v21  ;;  %v240_v13 = vld [vmem:[#allocation8 + $0x8] sm:$0xff]  ;;  %v239_v18 = vld [vmem:[#allocation8] sm:$0xff] }
  0x2a   :  { %279 = vmatpush.msra.mxu2 %v250_v44  ;;  %299 = vmatpush.msra.mxu3 %v266_v45  ;;  %v256_v14 = vld [vmem:[#allocation8 + $0x88] sm:$0xff]  ;;  %v255_v19 = vld [vmem:[#allocation8 + $0x80] sm:$0xff] }
  0x2b   :  { %130 = vmatpush.msra.mxu0 %v89_v22  ;;  %150 = vmatpush.msra.mxu1 %v90_v23 }
  0x2c   :  { %280 = vmatpush.msra.mxu2 %v249_v46  ;;  %300 = vmatpush.msra.mxu3 %v265_v47 }
  0x2d   :  { %131 = vmatpush.msra.mxu0 %v87_v24  ;;  %151 = vmatpush.msra.mxu1 %v88_v25 }
  0x2e   :  { %281 = vmatpush.msra.mxu2 %v248_v52  ;;  %301 = vmatpush.msra.mxu3 %v264_v53 }
  0x2f   :  { %132 = vmatpush.msra.mxu0 %v85_v26  ;;  %152 = vmatpush.msra.mxu1 %v86_v27 }
  0x30   :  { %282 = vmatpush.msra.mxu2 %v247_v56  ;;  %302 = vmatpush.msra.mxu3 %v263_v57 }
  0x31   :  { %133 = vmatpush.msra.mxu0 %v83_v28  ;;  %153 = vmatpush.msra.mxu1 %v84_v29 }
  0x32   :  { %283 = vmatpush.msra.mxu2 %v246_v60  ;;  %303 = vmatpush.msra.mxu3 %v262_v61 }
  0x33   :  { %134 = vmatpush.msra.mxu0 %v81_v30  ;;  %154 = vmatpush.msra.mxu1 %v82_v31 }
  0x34   :  { %135 = vmatmul.f32.vlgmr.msra.gmra.mxu0 %v533_v32  ;;  %155 = vmatmul.f32.vlgmr.msra.gmra.mxu1 %v533_v32 }
  0x35   :  { %284 = vmatpush.msra.mxu2 %v245_v0  ;;  %304 = vmatpush.msra.mxu3 %v261_v1 }
  0x37   :  { %285 = vmatpush.msra.mxu2 %v244_v4  ;;  %305 = vmatpush.msra.mxu3 %v260_v5 }
  0x39   :  { %286 = vmatpush.msra.mxu2 %v243_v6  ;;  %306 = vmatpush.msra.mxu3 %v259_v7 }
  0x3b   :  { %287 = vmatpush.msra.mxu2 %v242_v8  ;;  %307 = vmatpush.msra.mxu3 %v258_v9 }
  0x3d   :  { %288 = vmatpush.msra.mxu2 %v241_v10  ;;  %308 = vmatpush.msra.mxu3 %v257_v11 }
  0x3f   :  { %289 = vmatpush.msra.mxu2 %v240_v13  ;;  %309 = vmatpush.msra.mxu3 %v256_v14 }
  0x41   :  { %290 = vmatpush.msra.mxu2 %v239_v18  ;;  %310 = vmatpush.msra.mxu3 %v255_v19 }
  0xb1   :  { %v136_v48 = vpop.f32.mrf.mxu0  ;;  %v156_v49 = vpop.f32.mrf.mxu1 }
  0xb2   :  { %v537_v50 = vadd.f32 %v136_v48, %v115_v42  ;;  %v539_v51 = vadd.f32 %v156_v49, %v116_v43 }
  0xb4   :  { %v542_v54 = vmul.f32 0.70710677, %v537_v50  ;;  %v545_v55 = vmul.f32 0.70710677, %v539_v51  ;;  %v159_v10 = vmul.f32 0.5, %v537_v50  ;;  %v160_v13 = vmul.f32 0.5, %v539_v51 }
  0xb6   :  { %v548_v58 = vand.u32 2147483647, %v542_v54  ;;  %v551_v59 = vand.u32 2147483647, %v545_v55  ;;  %vm229_vm8 = vcmp.ge.f32.partialorder %v542_v54, 0.0  ;;  %vm230_vm9 = vcmp.ge.f32.partialorder %v545_v55, 0.0 }
  0xb8   :  { %v165_v62 = vmul.f32 0.3275911, %v548_v58  ;;  %v166_v63 = vmul.f32 0.3275911, %v551_v59  ;;  %v217_v34 = vsub.f32 0.0, %v548_v58  ;;  %v218_v37 = vsub.f32 0.0, %v551_v59 }
  0xba   :  { %v167_v2 = vadd.f32 1.0, %v165_v62  ;;  %v168_v3 = vadd.f32 1.0, %v166_v63  ;;  %v219_v42 = vmul.f32 %v217_v34, %v548_v58  ;;  %v220_v44 = vmul.f32 %v218_v37, %v551_v59 }
  0xbc   :  { %346 = vrcp.f32 %v167_v2  ;;  %v180_v22 = vand.u32 2147483648, %v167_v2  ;;  %v178_v24 = vand.u32 2147483647, %v167_v2  ;;  %v195_v25 = vand.u32 2147483648, %v168_v3 }
  0xbd   :  { %348 = vrcp.f32 %v168_v3  ;;  %v193_v27 = vand.u32 2147483647, %v168_v3  ;;  %vm174_vm2 = vweird.f32 %v167_v2  ;;  %vm189_vm3 = vweird.f32 %v168_v3 }
  0xbe   :  { %v181_v29 = vor.u32 1.1754944e-38, %v180_v22  ;;  %vm179_vm5 = vcmp.eq.f32.partialorder %v178_v24, 8.507059e+37  ;;  %v196_v33 = vor.u32 1.1754944e-38, %v195_v25  ;;  %v221_v48 = vmul.f32 1.442695, %v219_v42 }
  0xbf   :  { %vm194_vm7 = vcmp.eq.f32.partialorder %v193_v27, 8.507059e+37  ;;  %v223_v52 = vmul.f32 1.442695, %v220_v44 }
  0xc0   :  { %350 = vpow2.f32 %v221_v48 }
  0xc1   :  { %352 = vpow2.f32 %v223_v52 }
  0xc2   :  { %v347_v12 = vpop.eup %346 }
  0xc3   :  { %v349_v15 = vpop.eup %348  ;;  %v170_v16 = vmul.f32 %v347_v12, %v167_v2  ;;  %vm175_vm0 = vweird.f32 %v347_v12 }
  0xc4   :  { %v185_v17 = vmul.f32 %v349_v15, %v168_v3  ;;  %vm190_vm1 = vweird.f32 %v349_v15  ;;  %vm176_vm4 = vmor %vm174_vm2, %vm175_vm0 }
  0xc5   :  { %v171_v20 = vsub.f32 1.0, %v170_v16  ;;  %vm191_vm6 = vmor %vm189_vm3, %vm190_vm1 }
  0xc6   :  { %v186_v21 = vsub.f32 1.0, %v185_v17  ;;  %v351_v1 = vpop.eup %350  ;;  %v345_v17 = vld [vmem:[%s574_s4] ss:$0 sm:$0xff] }
  0xc7   :  { %v172_v23 = vmul.f32 %v347_v12, %v171_v20  ;;  %v353_v59 = vpop.eup %352 }
  0xc8   :  { %v187_v26 = vmul.f32 %v349_v15, %v186_v21 }
  0xc9   :  { %v173_v28 = vadd.f32 %v347_v12, %v172_v23 }
  0xca   :  { %v188_v30 = vadd.f32 %v349_v15, %v187_v26 }
  0xcb   :  { %v177_v31 = vsel %vm176_vm4, %v347_v12, %v173_v28 }
  0xcc   :  { %v182_v35 = vsel %vm179_vm5, %v181_v29, %v177_v31  ;;  %v192_v36 = vsel %vm191_vm6, %v349_v15, %v188_v30 }
  0xcd   :  { %v199_v38 = vmul.f32 1.0614054, %v182_v35  ;;  %v197_v39 = vsel %vm194_vm7, %v196_v33, %v192_v36 }
  0xce   :  { %v200_v40 = vmul.f32 1.0614054, %v197_v39 }
  0xcf   :  { %v201_v41 = vadd.f32 -1.4531521, %v199_v38 }
  0xd0   :  { %v202_v43 = vadd.f32 -1.4531521, %v200_v40 }
  0xd1   :  { %v203_v45 = vmul.f32 %v201_v41, %v182_v35 }
  0xd2   :  { %v204_v46 = vmul.f32 %v202_v43, %v197_v39 }
  0xd3   :  { %v205_v47 = vadd.f32 1.4214138, %v203_v45 }
  0xd4   :  { %v206_v49 = vadd.f32 1.4214138, %v204_v46 }
  0xd5   :  { %v207_v53 = vmul.f32 %v205_v47, %v182_v35 }
  0xd6   :  { %v208_v56 = vmul.f32 %v206_v49, %v197_v39 }
  0xd7   :  { %v209_v57 = vadd.f32 -0.28449672, %v207_v53 }
  0xd8   :  { %v210_v60 = vadd.f32 -0.28449672, %v208_v56 }
  0xd9   :  { %v211_v61 = vmul.f32 %v209_v57, %v182_v35 }
  0xda   :  { %v212_v62 = vmul.f32 %v210_v60, %v197_v39 }
  0xdb   :  { %v213_v63 = vadd.f32 0.2548296, %v211_v61 }
  0xdc   :  { %v214_v0 = vadd.f32 0.2548296, %v212_v62 }
  0xdd   :  { %v215_v58 = vmul.f32 %v213_v63, %v182_v35 }
  0xde   :  { %v216_v2 = vmul.f32 %v214_v0, %v197_v39 }
  0xdf   :  { %v225_v3 = vmul.f32 %v351_v1, %v215_v58 }
  0xe0   :  { %v226_v4 = vmul.f32 %v353_v59, %v216_v2 }
  0xe1   :  { %v227_v5 = vsub.f32 1.0, %v225_v3 }
  0xe2   :  { %v228_v6 = vsub.f32 1.0, %v226_v4 }
  0xe3   :  { %v231_v7 = vsub.f32 0.0, %v227_v5 }
  0xe4   :  { %v232_v8 = vsub.f32 0.0, %v228_v6 }
  0xe5   :  { %v233_v9 = vsel %vm229_vm8, %v227_v5, %v231_v7 }
  0xe6   :  { %v235_v11 = vadd.f32 1.0, %v233_v9  ;;  %v234_v12 = vsel %vm230_vm9, %v228_v6, %v232_v8 }
  0xe7   :  { %v236_v14 = vadd.f32 1.0, %v234_v12 }
  0xe8   :  { %v237_v15 = vmul.f32 %v235_v11, %v159_v10 }
  0xe9   :  { %v238_v16 = vmul.f32 %v236_v14, %v160_v13 }
  0xea   :  { %291 = vmatmul.f32.vlgmr.msra.gmra.mxu2 %v237_v15 }
  0xeb   :  { %311 = vmatmul.f32.vlgmr.msra.gmra.mxu3 %v238_v16 }
 0x16d   :  { %v292_v54 = vpop.f32.mrf.mxu2 }
 0x16e   :  { %v293_v18 = vadd.f32 %v345_v17, %v292_v54  ;;  %v312_v19 = vpop.f32.mrf.mxu3 }
 0x170   :  { %v313_v50 = vadd.f32 %v312_v19, %v293_v18 }
 0x172   :  { %v315_v51 = vadd.f32 %v313_v50, %v533_v32 }
 0x174   :  { %316 = vst [vmem:[#allocation10] sm:$0xf] %v315_v51 }
 0x175   :  { %327 = dma.vmem_to_hbm [thread:$0]  %s323_s16, 64, %s325_s19, [#allocation4]  }
 0x176   :  { %480 = dma.done.wait [#allocation4], 64  }
 0x177   :  { %481 = vsyncadd [#allocation4], 4294967232 }
 0x178   :  { %332 = vsyncpa [#allocation3], 1 }
 0x179   :  { %333 = vsyncpa [#allocation6], 1 }
 0x17a   :  { %334 = vsyncpa [#allocation9], 1 }
 0x17b   :  { %335 = vsyncpa [#allocation4], 1 }

// kernel: tpu_custom_call.1
= control target key start
LH: loop header
LB: loop body
LE: loop exit
PB: predicated region body
PF: predicated region fallthrough
CT: control target
= control target key end

     0   :  { %10 = vsyncpa [#allocation3], 0  ;;  %s570_s0 = inlined_call_operand.hbm [shape: f32[4,128], index: 0, kind: input, shape index: {}]   ;;  %s571_s1 = inlined_call_operand.hbm [shape: f32[128,256], index: 1, kind: input, shape index: {}]   ;;  %s572_s2 = inlined_call_operand.hbm [shape: f32[1,256], index: 2, kind: input, shape index: {}]   ;;  %s573_s3 = inlined_call_operand.hbm [shape: f32[256,128], index: 3, kind: input, shape index: {}]   ;;  %s574_s4 = inlined_call_operand.vmem [shape: f32[1,128], index: 4, kind: input, shape index: {}]   ;;  %s575_s5 = inlined_call_operand.hbm [shape: f32[4,128], index: 5, kind: output, shape index: {}]  }
   0x1   :  { %11 = vsyncpa [#allocation6], 0 }
   0x2   :  { %12 = vsyncpa [#allocation9], 0  ;;  %s29_s20 = sshll.u32 %s571_s1, 4  ;;  %s30_s20 = int_to_ptr.hbm [resolvable:$true] %s29_s20 }
   0x3   :  { %13 = vsyncpa [#allocation4], 0  ;;  %s482_s21 = smov [#allocation5]   ;;  %s19_s25 = sshll.u32 %s570_s0, 4  ;;  %s20_s25 = int_to_ptr.hbm [resolvable:$true] %s19_s25 }
   0x4   :  { %s31_s22 = sshll.u32 %s482_s21, 4  ;;  %s483_s26 = smov 256   ;;  %s32_s22 = int_to_ptr.vmem [resolvable:$true] %s31_s22 }
   0x5   :  { %s484_s27 = smov 16   ;;  %s485_s28 = smov [#allocation2]  }
   0x6   :  { %37 = dma.hbm_to_vmem [thread:$0]  %s30_s20, 4096, %s32_s22, [#allocation6], %s483_s26, %s483_s26, %s484_s27  }
   0x7   :  { %s21_s29 = sshll.u32 %s485_s28, 4  ;;  %s43_s7 = sshll.u32 %s572_s2, 4  ;;  %s22_s29 = int_to_ptr.vmem [resolvable:$true] %s21_s29  ;;  %s44_s7 = int_to_ptr.hbm [resolvable:$true] %s43_s7 }
   0x8   :  { %24 = dma.hbm_to_vmem [thread:$0]  %s20_s25, 64, %s22_s29, [#allocation3]  }
   0x9   :  { %s53_s9 = sshll.u32 %s573_s3, 4  ;;  %s486_s10 = smov [#allocation7]   ;;  %s54_s9 = int_to_ptr.hbm [resolvable:$true] %s53_s9 }
   0xa   :  { %s45_s11 = sshll.u32 %s486_s10, 4  ;;  %s487_s0 = smov [#allocation8]   ;;  %s46_s11 = int_to_ptr.vmem [resolvable:$true] %s45_s11 }
   0xb   :  { %48 = dma.hbm_to_vmem [thread:$0]  %s44_s7, 32, %s46_s11, [#allocation6]  }
   0xc   :  { %s55_s12 = sshll.u32 %s487_s0, 4  ;;  %s488_s13 = smov 128   ;;  %s56_s12 = int_to_ptr.vmem [resolvable:$true] %s55_s12 }
   0xd   :  { %s489_s14 = smov 8  }
   0xe   :  { %61 = dma.hbm_to_vmem [thread:$0]  %s54_s9, 4096, %s56_s12, [#allocation9], %s488_s13, %s488_s13, %s489_s14  }
   0xf   :  { %474 = dma.done.wait [#allocation3], 64  }
  0x10   :  { %475 = vsyncadd [#allocation3], 4294967232 }
  0x11   :  { %476 = dma.done.wait [#allocation6], 4128  }
  0x12   :  { %477 = vsyncadd [#allocation6], 4294963168 }
  0x13   :  { %478 = dma.done.wait [#allocation9], 4096  }
  0x14   :  { %479 = vsyncadd [#allocation9], 4294963200  ;;  %v111_v0 = vld [vmem:[#allocation5 + $0xf0] sm:$0xff]  ;;  %v112_v1 = vld [vmem:[#allocation5 + $0xf8] sm:$0xff]  ;;  %s490_s15 = smov [#allocation10]   ;;  %s324_s19 = sshll.u32 %s575_s5, 4  ;;  %s325_s19 = int_to_ptr.hbm [resolvable:$true] %s324_s19 }
  0x15   :  { %v109_v2 = vld [vmem:[#allocation5 + $0xe0] sm:$0xff]  ;;  %119 = vmatpush.msra.mxu0 %v111_v0  ;;  %139 = vmatpush.msra.mxu1 %v112_v1  ;;  %v110_v3 = vld [vmem:[#allocation5 + $0xe8] sm:$0xff]  ;;  %v107_v4 = vld [vmem:[#allocation5 + $0xd0] sm:$0xff]  ;;  %s322_s16 = sshll.u32 %s490_s15, 4  ;;  %s323_s16 = int_to_ptr.vmem [resolvable:$true] %s322_s16 }
  0x16   :  { %v108_v5 = vld [vmem:[#allocation5 + $0xd8] sm:$0xff]  ;;  %v105_v6 = vld [vmem:[#allocation5 + $0xc0] sm:$0xff]  ;;  %v106_v7 = vld [vmem:[#allocation5 + $0xc8] sm:$0xff] }
  0x17   :  { %120 = vmatpush.msra.mxu0 %v109_v2  ;;  %140 = vmatpush.msra.mxu1 %v110_v3  ;;  %v103_v8 = vld [vmem:[#allocation5 + $0xb0] sm:$0xff]  ;;  %v104_v9 = vld [vmem:[#allocation5 + $0xb8] sm:$0xff]  ;;  %v101_v10 = vld [vmem:[#allocation5 + $0xa0] sm:$0xff] }
  0x18   :  { %v102_v11 = vld [vmem:[#allocation5 + $0xa8] sm:$0xff]  ;;  %v99_v12 = vld [vmem:[#allocation5 + $0x90] sm:$0xff]  ;;  %v100_v13 = vld [vmem:[#allocation5 + $0x98] sm:$0xff] }
  0x19   :  { %121 = vmatpush.msra.mxu0 %v107_v4  ;;  %141 = vmatpush.msra.mxu1 %v108_v5  ;;  %v97_v14 = vld [vmem:[#allocation5 + $0x80] sm:$0xff]  ;;  %v98_v15 = vld [vmem:[#allocation5 + $0x88] sm:$0xff]  ;;  %v95_v16 = vld [vmem:[#allocation5 + $0x70] sm:$0xff] }
  0x1a   :  { %v96_v17 = vld [vmem:[#allocation5 + $0x78] sm:$0xff]  ;;  %v93_v18 = vld [vmem:[#allocation5 + $0x60] sm:$0xff]  ;;  %v94_v19 = vld [vmem:[#allocation5 + $0x68] sm:$0xff] }
  0x1b   :  { %122 = vmatpush.msra.mxu0 %v105_v6  ;;  %142 = vmatpush.msra.mxu1 %v106_v7  ;;  %v91_v20 = vld [vmem:[#allocation5 + $0x50] sm:$0xff]  ;;  %v92_v21 = vld [vmem:[#allocation5 + $0x58] sm:$0xff]  ;;  %v89_v22 = vld [vmem:[#allocation5 + $0x40] sm:$0xff] }
  0x1c   :  { %v90_v23 = vld [vmem:[#allocation5 + $0x48] sm:$0xff]  ;;  %v87_v24 = vld [vmem:[#allocation5 + $0x30] sm:$0xff]  ;;  %v88_v25 = vld [vmem:[#allocation5 + $0x38] sm:$0xff] }
  0x1d   :  { %123 = vmatpush.msra.mxu0 %v103_v8  ;;  %143 = vmatpush.msra.mxu1 %v104_v9  ;;  %v85_v26 = vld [vmem:[#allocation5 + $0x20] sm:$0xff]  ;;  %v86_v27 = vld [vmem:[#allocation5 + $0x28] sm:$0xff]  ;;  %v83_v28 = vld [vmem:[#allocation5 + $0x10] sm:$0xff] }
  0x1e   :  { %v84_v29 = vld [vmem:[#allocation5 + $0x18] sm:$0xff]  ;;  %v81_v30 = vld [vmem:[#allocation5] sm:$0xff]  ;;  %v82_v31 = vld [vmem:[#allocation5 + $0x8] sm:$0xff] }
  0x1f   :  { %124 = vmatpush.msra.mxu0 %v101_v10  ;;  %144 = vmatpush.msra.mxu1 %v102_v11  ;;  %v533_v32 = vld [vmem:[#allocation2] sm:$0xf]  ;;  %v253_v35 = vld [vmem:[#allocation8 + $0x70] sm:$0xff]  ;;  %v252_v37 = vld [vmem:[#allocation8 + $0x68] sm:$0xff] }
  0x20   :  { %v254_v33 = vld [vmem:[#allocation8 + $0x78] sm:$0xff]  ;;  %v269_v36 = vld [vmem:[#allocation8 + $0xf0] sm:$0xff]  ;;  %v268_v38 = vld [vmem:[#allocation8 + $0xe8] sm:$0xff] }
  0x21   :  { %125 = vmatpush.msra.mxu0 %v99_v12  ;;  %145 = vmatpush.msra.mxu1 %v100_v13  ;;  %v270_v34 = vld [vmem:[#allocation8 + $0xf8] sm:$0xff]  ;;  %v251_v40 = vld [vmem:[#allocation8 + $0x60] sm:$0xff]  ;;  %v249_v46 = vld [vmem:[#allocation8 + $0x50] sm:$0xff] }
  0x22   :  { %275 = vmatpush.msra.mxu2 %v254_v33  ;;  %295 = vmatpush.msra.mxu3 %v270_v34  ;;  %v113_v39 = vld [vmem:[#allocation7] sm:$0x3]  ;;  %v267_v41 = vld [vmem:[#allocation8 + $0xe0] sm:$0xff]  ;;  %v265_v47 = vld [vmem:[#allocation8 + $0xd0] sm:$0xff] }
  0x23   :  { %126 = vmatpush.msra.mxu0 %v97_v14  ;;  %146 = vmatpush.msra.mxu1 %v98_v15  ;;  %v115_v42 = vperm.slane %v113_v39, 0  ;;  %v116_v43 = vperm.slane %v113_v39, 1  ;;  %v250_v44 = vld [vmem:[#allocation8 + $0x58] sm:$0xff]  ;;  %v248_v52 = vld [vmem:[#allocation8 + $0x48] sm:$0xff]  ;;  %v247_v56 = vld [vmem:[#allocation8 + $0x40] sm:$0xff] }
  0x24   :  { %276 = vmatpush.msra.mxu2 %v253_v35  ;;  %296 = vmatpush.msra.mxu3 %v269_v36  ;;  %v266_v45 = vld [vmem:[#allocation8 + $0xd8] sm:$0xff]  ;;  %v264_v53 = vld [vmem:[#allocation8 + $0xc8] sm:$0xff]  ;;  %v263_v57 = vld [vmem:[#allocation8 + $0xc0] sm:$0xff] }
  0x25   :  { %127 = vmatpush.msra.mxu0 %v95_v16  ;;  %147 = vmatpush.msra.mxu1 %v96_v17  ;;  %v246_v60 = vld [vmem:[#allocation8 + $0x38] sm:$0xff]  ;;  %v245_v0 = vld [vmem:[#allocation8 + $0x30] sm:$0xff]  ;;  %v244_v4 = vld [vmem:[#allocation8 + $0x28] sm:$0xff] }
  0x26   :  { %277 = vmatpush.msra.mxu2 %v252_v37  ;;  %297 = vmatpush.msra.mxu3 %v268_v38  ;;  %v262_v61 = vld [vmem:[#allocation8 + $0xb8] sm:$0xff]  ;;  %v261_v1 = vld [vmem:[#allocation8 + $0xb0] sm:$0xff]  ;;  %v260_v5 = vld [vmem:[#allocation8 + $0xa8] sm:$0xff] }
  0x27   :  { %128 = vmatpush.msra.mxu0 %v93_v18  ;;  %148 = vmatpush.msra.mxu1 %v94_v19  ;;  %v243_v6 = vld [vmem:[#allocation8 + $0x20] sm:$0xff]  ;;  %v242_v8 = vld [vmem:[#allocation8 + $0x18] sm:$0xff]  ;;  %v241_v10 = vld [vmem:[#allocation8 + $0x10] sm:$0xff] }
  0x28   :  { %278 = vmatpush.msra.mxu2 %v251_v40  ;;  %298 = vmatpush.msra.mxu3 %v267_v41  ;;  %v259_v7 = vld [vmem:[#allocation8 + $0xa0] sm:$0xff]  ;;  %v258_v9 = vld [vmem:[#allocation8 + $0x98] sm:$0xff]  ;;  %v257_v11 = vld [vmem:[#allocation8 + $0x90] sm:$0xff] }
  0x29   :  { %129 = vmatpush.msra.mxu0 %v91_v20  ;;  %149 = vmatpush.msra.mxu1 %v92_v21  ;;  %v240_v13 = vld [vmem:[#allocation8 + $0x8] sm:$0xff]  ;;  %v239_v18 = vld [vmem:[#allocation8] sm:$0xff] }
  0x2a   :  { %279 = vmatpush.msra.mxu2 %v250_v44  ;;  %299 = vmatpush.msra.mxu3 %v266_v45  ;;  %v256_v14 = vld [vmem:[#allocation8 + $0x88] sm:$0xff]  ;;  %v255_v19 = vld [vmem:[#allocation8 + $0x80] sm:$0xff] }
  0x2b   :  { %130 = vmatpush.msra.mxu0 %v89_v22  ;;  %150 = vmatpush.msra.mxu1 %v90_v23 }
  0x2c   :  { %280 = vmatpush.msra.mxu2 %v249_v46  ;;  %300 = vmatpush.msra.mxu3 %v265_v47 }
  0x2d   :  { %131 = vmatpush.msra.mxu0 %v87_v24  ;;  %151 = vmatpush.msra.mxu1 %v88_v25 }
  0x2e   :  { %281 = vmatpush.msra.mxu2 %v248_v52  ;;  %301 = vmatpush.msra.mxu3 %v264_v53 }
  0x2f   :  { %132 = vmatpush.msra.mxu0 %v85_v26  ;;  %152 = vmatpush.msra.mxu1 %v86_v27 }
  0x30   :  { %282 = vmatpush.msra.mxu2 %v247_v56  ;;  %302 = vmatpush.msra.mxu3 %v263_v57 }
  0x31   :  { %133 = vmatpush.msra.mxu0 %v83_v28  ;;  %153 = vmatpush.msra.mxu1 %v84_v29 }
  0x32   :  { %283 = vmatpush.msra.mxu2 %v246_v60  ;;  %303 = vmatpush.msra.mxu3 %v262_v61 }
  0x33   :  { %134 = vmatpush.msra.mxu0 %v81_v30  ;;  %154 = vmatpush.msra.mxu1 %v82_v31 }
  0x34   :  { %135 = vmatmul.f32.vlgmr.msra.gmra.mxu0 %v533_v32  ;;  %155 = vmatmul.f32.vlgmr.msra.gmra.mxu1 %v533_v32 }
  0x35   :  { %284 = vmatpush.msra.mxu2 %v245_v0  ;;  %304 = vmatpush.msra.mxu3 %v261_v1 }
  0x37   :  { %285 = vmatpush.msra.mxu2 %v244_v4  ;;  %305 = vmatpush.msra.mxu3 %v260_v5 }
  0x39   :  { %286 = vmatpush.msra.mxu2 %v243_v6  ;;  %306 = vmatpush.msra.mxu3 %v259_v7 }
  0x3b   :  { %287 = vmatpush.msra.mxu2 %v242_v8  ;;  %307 = vmatpush.msra.mxu3 %v258_v9 }
  0x3d   :  { %288 = vmatpush.msra.mxu2 %v241_v10  ;;  %308 = vmatpush.msra.mxu3 %v257_v11 }
  0x3f   :  { %289 = vmatpush.msra.mxu2 %v240_v13  ;;  %309 = vmatpush.msra.mxu3 %v256_v14 }
  0x41   :  { %290 = vmatpush.msra.mxu2 %v239_v18  ;;  %310 = vmatpush.msra.mxu3 %v255_v19 }
  0xb1   :  { %v136_v48 = vpop.f32.mrf.mxu0  ;;  %v156_v49 = vpop.f32.mrf.mxu1 }
  0xb2   :  { %v537_v50 = vadd.f32 %v136_v48, %v115_v42  ;;  %v539_v51 = vadd.f32 %v156_v49, %v116_v43 }
  0xb4   :  { %v542_v54 = vmul.f32 0.70710677, %v537_v50  ;;  %v545_v55 = vmul.f32 0.70710677, %v539_v51  ;;  %v159_v10 = vmul.f32 0.5, %v537_v50  ;;  %v160_v13 = vmul.f32 0.5, %v539_v51 }
  0xb6   :  { %v548_v58 = vand.u32 2147483647, %v542_v54  ;;  %v551_v59 = vand.u32 2147483647, %v545_v55  ;;  %vm229_vm8 = vcmp.ge.f32.partialorder %v542_v54, 0.0  ;;  %vm230_vm9 = vcmp.ge.f32.partialorder %v545_v55, 0.0 }
  0xb8   :  { %v165_v62 = vmul.f32 0.3275911, %v548_v58  ;;  %v166_v63 = vmul.f32 0.3275911, %v551_v59  ;;  %v217_v34 = vsub.f32 0.0, %v548_v58  ;;  %v218_v37 = vsub.f32 0.0, %v551_v59 }
  0xba   :  { %v167_v2 = vadd.f32 1.0, %v165_v62  ;;  %v168_v3 = vadd.f32 1.0, %v166_v63  ;;  %v219_v42 = vmul.f32 %v217_v34, %v548_v58  ;;  %v220_v44 = vmul.f32 %v218_v37, %v551_v59 }
  0xbc   :  { %346 = vrcp.f32 %v167_v2  ;;  %v180_v22 = vand.u32 2147483648, %v167_v2  ;;  %v178_v24 = vand.u32 2147483647, %v167_v2  ;;  %v195_v25 = vand.u32 2147483648, %v168_v3 }
  0xbd   :  { %348 = vrcp.f32 %v168_v3  ;;  %v193_v27 = vand.u32 2147483647, %v168_v3  ;;  %vm174_vm2 = vweird.f32 %v167_v2  ;;  %vm189_vm3 = vweird.f32 %v168_v3 }
  0xbe   :  { %v181_v29 = vor.u32 1.1754944e-38, %v180_v22  ;;  %vm179_vm5 = vcmp.eq.f32.partialorder %v178_v24, 8.507059e+37  ;;  %v196_v33 = vor.u32 1.1754944e-38, %v195_v25  ;;  %v221_v48 = vmul.f32 1.442695, %v219_v42 }
  0xbf   :  { %vm194_vm7 = vcmp.eq.f32.partialorder %v193_v27, 8.507059e+37  ;;  %v223_v52 = vmul.f32 1.442695, %v220_v44 }
  0xc0   :  { %350 = vpow2.f32 %v221_v48 }
  0xc1   :  { %352 = vpow2.f32 %v223_v52 }
  0xc2   :  { %v347_v12 = vpop.eup %346 }
  0xc3   :  { %v349_v15 = vpop.eup %348  ;;  %v170_v16 = vmul.f32 %v347_v12, %v167_v2  ;;  %vm175_vm0 = vweird.f32 %v347_v12 }
  0xc4   :  { %v185_v17 = vmul.f32 %v349_v15, %v168_v3  ;;  %vm190_vm1 = vweird.f32 %v349_v15  ;;  %vm176_vm4 = vmor %vm174_vm2, %vm175_vm0 }
  0xc5   :  { %v171_v20 = vsub.f32 1.0, %v170_v16  ;;  %vm191_vm6 = vmor %vm189_vm3, %vm190_vm1 }
  0xc6   :  { %v186_v21 = vsub.f32 1.0, %v185_v17  ;;  %v351_v1 = vpop.eup %350  ;;  %v345_v17 = vld [vmem:[%s574_s4] ss:$0 sm:$0xff] }
  0xc7   :  { %v172_v23 = vmul.f32 %v347_v12, %v171_v20  ;;  %v353_v59 = vpop.eup %352 }
  0xc8   :  { %v187_v26 = vmul.f32 %v349_v15, %v186_v21 }
  0xc9   :  { %v173_v28 = vadd.f32 %v347_v12, %v172_v23 }
  0xca   :  { %v188_v30 = vadd.f32 %v349_v15, %v187_v26 }
  0xcb   :  { %v177_v31 = vsel %vm176_vm4, %v347_v12, %v173_v28 }
  0xcc   :  { %v182_v35 = vsel %vm179_vm5, %v181_v29, %v177_v31  ;;  %v192_v36 = vsel %vm191_vm6, %v349_v15, %v188_v30 }
  0xcd   :  { %v199_v38 = vmul.f32 1.0614054, %v182_v35  ;;  %v197_v39 = vsel %vm194_vm7, %v196_v33, %v192_v36 }
  0xce   :  { %v200_v40 = vmul.f32 1.0614054, %v197_v39 }
  0xcf   :  { %v201_v41 = vadd.f32 -1.4531521, %v199_v38 }
  0xd0   :  { %v202_v43 = vadd.f32 -1.4531521, %v200_v40 }
  0xd1   :  { %v203_v45 = vmul.f32 %v201_v41, %v182_v35 }
  0xd2   :  { %v204_v46 = vmul.f32 %v202_v43, %v197_v39 }
  0xd3   :  { %v205_v47 = vadd.f32 1.4214138, %v203_v45 }
  0xd4   :  { %v206_v49 = vadd.f32 1.4214138, %v204_v46 }
  0xd5   :  { %v207_v53 = vmul.f32 %v205_v47, %v182_v35 }
  0xd6   :  { %v208_v56 = vmul.f32 %v206_v49, %v197_v39 }
  0xd7   :  { %v209_v57 = vadd.f32 -0.28449672, %v207_v53 }
  0xd8   :  { %v210_v60 = vadd.f32 -0.28449672, %v208_v56 }
  0xd9   :  { %v211_v61 = vmul.f32 %v209_v57, %v182_v35 }
  0xda   :  { %v212_v62 = vmul.f32 %v210_v60, %v197_v39 }
  0xdb   :  { %v213_v63 = vadd.f32 0.2548296, %v211_v61 }
  0xdc   :  { %v214_v0 = vadd.f32 0.2548296, %v212_v62 }
  0xdd   :  { %v215_v58 = vmul.f32 %v213_v63, %v182_v35 }
  0xde   :  { %v216_v2 = vmul.f32 %v214_v0, %v197_v39 }
  0xdf   :  { %v225_v3 = vmul.f32 %v351_v1, %v215_v58 }
  0xe0   :  { %v226_v4 = vmul.f32 %v353_v59, %v216_v2 }
  0xe1   :  { %v227_v5 = vsub.f32 1.0, %v225_v3 }
  0xe2   :  { %v228_v6 = vsub.f32 1.0, %v226_v4 }
  0xe3   :  { %v231_v7 = vsub.f32 0.0, %v227_v5 }
  0xe4   :  { %v232_v8 = vsub.f32 0.0, %v228_v6 }
  0xe5   :  { %v233_v9 = vsel %vm229_vm8, %v227_v5, %v231_v7 }
  0xe6   :  { %v235_v11 = vadd.f32 1.0, %v233_v9  ;;  %v234_v12 = vsel %vm230_vm9, %v228_v6, %v232_v8 }
  0xe7   :  { %v236_v14 = vadd.f32 1.0, %v234_v12 }
  0xe8   :  { %v237_v15 = vmul.f32 %v235_v11, %v159_v10 }
  0xe9   :  { %v238_v16 = vmul.f32 %v236_v14, %v160_v13 }
  0xea   :  { %291 = vmatmul.f32.vlgmr.msra.gmra.mxu2 %v237_v15 }
  0xeb   :  { %311 = vmatmul.f32.vlgmr.msra.gmra.mxu3 %v238_v16 }
 0x16d   :  { %v292_v54 = vpop.f32.mrf.mxu2 }
 0x16e   :  { %v293_v18 = vadd.f32 %v345_v17, %v292_v54  ;;  %v312_v19 = vpop.f32.mrf.mxu3 }
 0x170   :  { %v313_v50 = vadd.f32 %v312_v19, %v293_v18 }
 0x172   :  { %v315_v51 = vadd.f32 %v313_v50, %v533_v32 }
 0x174   :  { %316 = vst [vmem:[#allocation10] sm:$0xf] %v315_v51 }
 0x175   :  { %327 = dma.vmem_to_hbm [thread:$0]  %s323_s16, 64, %s325_s19, [#allocation4]  }
 0x176   :  { %480 = dma.done.wait [#allocation4], 64  }
 0x177   :  { %481 = vsyncadd [#allocation4], 4294967232 }
 0x178   :  { %332 = vsyncpa [#allocation3], 1 }
 0x179   :  { %333 = vsyncpa [#allocation6], 1 }
 0x17a   :  { %334 = vsyncpa [#allocation9], 1 }
 0x17b   :  { %335 = vsyncpa [#allocation4], 1 }

</bundles_post_ra>
